<compile_context>
chip_gen: v6e
topology: v6e:2x2x1
jax: 0.10.0
libtpu: 0.0.40
codegen_flags: <defaults>
</compile_context>

<pallas_src>
import functools

import jax
import jax.numpy as jnp
from jax.experimental import pallas as pl
from jax.experimental.pallas import tpu as pltpu


def casp_kernel(x_ref, w1x_ref, w1m_ref, w1s_ref, b1_ref, bn1s_ref, bn1b_ref,
                w2_ref, b2_ref, bn2s_mu_ref, bn2b_mu_ref, bn2s_sg_ref,
                bn2b_sg_ref, o_ref, *, inv_tm1, mxu_dtype):
    """One grid step = Bb batch elements; whole (Bb, T, C) slab resident in VMEM."""
    x = x_ref[...]                                            # (Bb, T, C) f32
    Bb, T, C = x.shape
    E = w1x_ref.shape[1]

    # ---- global stats over time (torch.std is unbiased: divide by T-1) ----
    m = jnp.mean(x, axis=1, keepdims=True)                    # (Bb, 1, C)
    d = x - m
    var = jnp.sum(d * d, axis=1) * inv_tm1                    # (Bb, C)
    s = jnp.sqrt(var)                                         # (Bb, C)
    m2 = m[:, 0, :]                                           # (Bb, C)

    # ---- attention MLP: Conv1d(3C->E,k=1) -> ReLU -> BN -> Tanh ----
    # conv1 input is concat([x, mean, std]) along channels; the mean/std
    # columns of the conv weight act on the (Bb, C) stats rows directly, and
    # the x part is one big (Bb*T, C) @ (C, E) matmul (bf16 operands, f32 acc).
    x2d = x.reshape(Bb * T, C).astype(mxu_dtype)
    h = jnp.dot(x2d, w1x_ref[...], preferred_element_type=jnp.float32)
    h = h.reshape(Bb, T, E)
    hs = jnp.dot(m2.astype(mxu_dtype), w1m_ref[...],
                 preferred_element_type=jnp.float32)          # (Bb, E)
    hs = hs + jnp.dot(s.astype(mxu_dtype), w1s_ref[...],
                      preferred_element_type=jnp.float32)
    h = h + hs[:, None, :] + b1_ref[...]
    h = jnp.maximum(h, 0.0)                                   # ReLU
    h = h * bn1s_ref[...] + bn1b_ref[...]                     # BatchNorm1d (eval)
    h = jnp.tanh(h)

    # ---- Conv1d(E->2E,k=1) -> Softmax over time ----
    logits = jnp.dot(h.reshape(Bb * T, E).astype(mxu_dtype), w2_ref[...],
                     preferred_element_type=jnp.float32).reshape(Bb, T, C)
    logits = logits + b2_ref[...]
    logits = logits - jnp.max(logits, axis=1, keepdims=True)
    e = jnp.exp(logits)
    att = e / jnp.sum(e, axis=1, keepdims=True)               # softmax over T

    # ---- attentive statistics pooling (reuse x*att) ----
    xa = x * att
    mu = jnp.sum(xa, axis=1)                                  # (Bb, C)
    sq = jnp.sum(xa * x, axis=1)                              # (Bb, C)
    sg = jnp.sqrt(jnp.maximum(sq - mu * mu, 1e-4))            # clamp(min=1e-4)

    # ---- final BatchNorm1d (eval), split into mu / sg halves; lane-aligned
    # stores into the (Bb, 2, C) output block (free reshape to (B, 4E) outside)
    o_ref[:, 0, :] = (mu * bn2s_mu_ref[...] + bn2b_mu_ref[...]).astype(o_ref.dtype)
    o_ref[:, 1, :] = (sg * bn2s_sg_ref[...] + bn2b_sg_ref[...]).astype(o_ref.dtype)


def _fold_bn(gamma, beta, running_mean, running_var, eps=1e-5):
    scale = gamma / jnp.sqrt(running_var + eps)
    shift = beta - running_mean * scale
    return scale, shift


def _pick_batch_block(B, T, max_bb=8):
    """Largest divisor of B (<= max_bb), preferring >= 2 grid steps so both
    v7x TensorCores get work.  Falls back to 1 when T is not sublane-aligned
    (the in-kernel (Bb,T,C)<->(Bb*T,C) reshapes are only free for T % 8 == 0)."""
    if T % 8 != 0:
        return 1
    divs = [d for d in range(1, min(B, max_bb) + 1) if B % d == 0]
    multi = [d for d in divs if B // d >= 2]
    return max(multi) if multi else max(divs)


def casp(x, params, *, mxu_dtype=jnp.bfloat16, max_batch_block=8):
    """x: (B, C, T) with C == 2*emb_size.  Returns (B, 4*emb_size)."""
    B, C, T = x.shape
    E = params["w1"].shape[0]                 # emb_size
    assert C == 2 * E and params["w1"].shape[1] == 3 * C
    assert T >= 2, "torch.std with ddof=1 needs at least 2 time frames"

    Bb = _pick_batch_block(B, T, max_batch_block)

    # kernel-friendly layouts (cheap XLA ops, done once outside the kernel)
    x_t = jnp.swapaxes(x, 1, 2)                     # (B, T, C)  time-major
    w1 = params["w1"]                               # (E, 3C)
    w1x_t = w1[:, :C].T.astype(mxu_dtype)           # (C, E)   x channels
    w1m_t = w1[:, C:2 * C].T.astype(mxu_dtype)      # (C, E)   mean channels
    w1s_t = w1[:, 2 * C:].T.astype(mxu_dtype)       # (C, E)   std channels
    b1 = params["b1"][None, :].astype(jnp.float32)  # (1, E)
    bn1_scale, bn1_shift = _fold_bn(params["bn1_gamma"], params["bn1_beta"],
                                    params["bn1_mean"], params["bn1_var"])
    w2_t = params["w2"].T.astype(mxu_dtype)         # (E, C)
    b2 = params["b2"][None, :].astype(jnp.float32)  # (1, C)
    bn2_scale, bn2_shift = _fold_bn(params["bn2_gamma"], params["bn2_beta"],
                                    params["bn2_mean"], params["bn2_var"])
    bn2s_mu = bn2_scale[None, :C]
    bn2s_sg = bn2_scale[None, C:]
    bn2b_mu = bn2_shift[None, :C]
    bn2b_sg = bn2_shift[None, C:]

    kernel = functools.partial(casp_kernel, inv_tm1=1.0 / (T - 1),
                               mxu_dtype=mxu_dtype)

    def full2d(shape):
        return pl.BlockSpec(shape, lambda b: (0, 0))

    grid = (B // Bb,)
    grid_spec = pltpu.PrefetchScalarGridSpec(
        num_scalar_prefetch=0,
        grid=grid,
        in_specs=[
            pl.BlockSpec((Bb, T, C), lambda b: (b, 0, 0)),    # x (time-major)
            full2d((C, E)),                                   # w1 (x part)
            full2d((C, E)),                                   # w1 (mean part)
            full2d((C, E)),                                   # w1 (std part)
            full2d((1, E)),                                   # b1
            full2d((1, E)),                                   # bn1 scale
            full2d((1, E)),                                   # bn1 shift
            full2d((E, C)),                                   # w2
            full2d((1, C)),                                   # b2
            full2d((1, C)),                                   # bn2 scale (mu half)
            full2d((1, C)),                                   # bn2 shift (mu half)
            full2d((1, C)),                                   # bn2 scale (sg half)
            full2d((1, C)),                                   # bn2 shift (sg half)
        ],
        out_specs=pl.BlockSpec((Bb, 2, C), lambda b: (b, 0, 0)),
    )

    # explicit VMEM budget: double-buffered x/out blocks + weights + generous
    # slack for in-kernel f32 temporaries (TODO(synk): tile T with an online
    # softmax for very large T*C slabs on v7x's 64 MiB VMEM).
    w_itemsize = jnp.dtype(mxu_dtype).itemsize
    x_blk = Bb * T * C * 4
    out_blk = Bb * 2 * C * 4
    w_bytes = (3 * C * E + E * C) * w_itemsize + (3 * E + 5 * C) * 4
    interm = 12 * Bb * T * max(C, E) * 4
    vmem_limit = int(min(max(2 * (x_blk + out_blk) + 2 * w_bytes + interm
                             + (4 << 20), 32 << 20), 112 << 20))

    mm_flops = 2 * T * C * E + 2 * 2 * C * E + 2 * T * E * C
    ew_flops = 14 * T * C + 8 * C
    cost = pl.CostEstimate(
        flops=int(B * (mm_flops + ew_flops)),
        transcendentals=int(B * (T * E + T * C + 3 * C)),
        bytes_accessed=int(4 * B * T * C + 4 * B * 2 * C
                           + int(w_bytes) * (B // Bb)),
    )

    out = pl.pallas_call(
        kernel,
        out_shape=jax.ShapeDtypeStruct((B, 2, C), x.dtype),
        grid_spec=grid_spec,
        compiler_params=pltpu.CompilerParams(
            dimension_semantics=("parallel",),
            vmem_limit_bytes=vmem_limit),
        cost_estimate=cost,
    )(x_t, w1x_t, w1m_t, w1s_t, b1, bn1_scale[None, :], bn1_shift[None, :],
      w2_t, b2, bn2s_mu, bn2b_mu, bn2s_sg, bn2b_sg)
    return out.reshape(B, 2 * C)                              # (B, 4E)


def casp_ref(x, params, eps=1e-5):
    """Plain-JAX reference mirroring the PyTorch forward (eval-mode BN)."""
    m = jnp.mean(x, axis=2, keepdims=True)
    s = jnp.std(x, axis=2, keepdims=True, ddof=1)
    gx = jnp.concatenate(
        [x, jnp.broadcast_to(m, x.shape), jnp.broadcast_to(s, x.shape)], axis=1)

    h = jnp.einsum("oc,bct->bot", params["w1"], gx) + params["b1"][None, :, None]
    h = jnp.maximum(h, 0.0)
    sc1, sh1 = _fold_bn(params["bn1_gamma"], params["bn1_beta"],
                        params["bn1_mean"], params["bn1_var"], eps)
    h = h * sc1[None, :, None] + sh1[None, :, None]
    h = jnp.tanh(h)

    logits = jnp.einsum("oc,bct->bot", params["w2"], h) + params["b2"][None, :, None]
    w = jax.nn.softmax(logits, axis=2)

    mu = jnp.sum(x * w, axis=2)
    sg = jnp.sqrt(jnp.clip(jnp.sum(x * x * w, axis=2) - mu ** 2, 1e-4, None))
    out = jnp.concatenate([mu, sg], axis=1)
    sc2, sh2 = _fold_bn(params["bn2_gamma"], params["bn2_beta"],
                        params["bn2_mean"], params["bn2_var"], eps)
    return out * sc2[None, :] + sh2[None, :]


def init_params(key, emb_size):
    E = emb_size
    C = 2 * E
    ks = jax.random.split(key, 10)
    s = 0.1
    return {
        "w1": s * jax.random.normal(ks[0], (E, 3 * C), jnp.float32),
        "b1": s * jax.random.normal(ks[1], (E,), jnp.float32),
        "bn1_gamma": 1.0 + s * jax.random.normal(ks[2], (E,), jnp.float32),
        "bn1_beta": s * jax.random.normal(ks[3], (E,), jnp.float32),
        "bn1_mean": s * jax.random.normal(ks[4], (E,), jnp.float32),
        "bn1_var": jnp.abs(1.0 + s * jax.random.normal(ks[5], (E,), jnp.float32)),
        "w2": s * jax.random.normal(ks[6], (C, E), jnp.float32),
        "b2": s * jax.random.normal(ks[7], (C,), jnp.float32),
        "bn2_gamma": 1.0 + s * jax.random.normal(ks[8], (2 * C,), jnp.float32),
        "bn2_beta": s * jax.random.normal(ks[9], (2 * C,), jnp.float32),
        "bn2_mean": jnp.zeros((2 * C,), jnp.float32),
        "bn2_var": jnp.ones((2 * C,), jnp.float32),
    }


if __name__ == "__main__":
    EMB = 16                      # emb_size -> x has 2*EMB = 32 channels
    B, T = 4, 16                  # batch, time frames

    key = jax.random.PRNGKey(0)
    kx, kp = jax.random.split(key)
    x = jax.random.normal(kx, (B, 2 * EMB, T), jnp.float32)
    params = init_params(kp, EMB)

    out = casp(x, params)
    out = jax.block_until_ready(out)

    ref = casp_ref(x, params)
    assert out.shape == (B, 4 * EMB)
    # tolerance loosened vs the all-f32 version because MXU operands are bf16
    err = float(jnp.max(jnp.abs(out - ref)))
    assert jnp.allclose(out, ref, atol=3e-2, rtol=3e-2), (
        f"mismatch vs reference (max abs err {err})")

    # TODO(synk): BatchNorm1d is implemented in inference mode (folded running
    # stats); training-mode batch statistics are not computed in-kernel.
    print("KERNEL_OK")
</pallas_src>

<mosaic_0001>
module attributes {stable_mosaic.version = 11 : i64} {
  func.func @casp_kernel(%arg0: i32, %arg1: memref<2x16x32xf32, #tpu.memory_space<vmem>>, %arg2: memref<32x16xbf16, #tpu.memory_space<vmem>>, %arg3: memref<32x16xbf16, #tpu.memory_space<vmem>>, %arg4: memref<32x16xbf16, #tpu.memory_space<vmem>>, %arg5: memref<1x16xf32, #tpu.memory_space<vmem>>, %arg6: memref<1x16xf32, #tpu.memory_space<vmem>>, %arg7: memref<1x16xf32, #tpu.memory_space<vmem>>, %arg8: memref<16x32xbf16, #tpu.memory_space<vmem>>, %arg9: memref<1x32xf32, #tpu.memory_space<vmem>>, %arg10: memref<1x32xf32, #tpu.memory_space<vmem>>, %arg11: memref<1x32xf32, #tpu.memory_space<vmem>>, %arg12: memref<1x32xf32, #tpu.memory_space<vmem>>, %arg13: memref<1x32xf32, #tpu.memory_space<vmem>>, %arg14: memref<2x2x32xf32, #tpu.memory_space<vmem>>) attributes {dimension_semantics = [#tpu.dimension_semantics<parallel>], iteration_bounds = array<i64: 2>, scalar_prefetch = 0 : i64, scratch_operands = 0 : i64, tpu.core_type = #tpu.core_type<tc>, window_params = [{transform_indices = @transform_0, window_bounds = array<i64: 2, 16, 32>}, {pipeline_mode = #tpu.pipeline_mode<synchronous>, transform_indices = @transform_1, window_bounds = array<i64: 32, 16>}, {pipeline_mode = #tpu.pipeline_mode<synchronous>, transform_indices = @transform_2, window_bounds = array<i64: 32, 16>}, {pipeline_mode = #tpu.pipeline_mode<synchronous>, transform_indices = @transform_3, window_bounds = array<i64: 32, 16>}, {pipeline_mode = #tpu.pipeline_mode<synchronous>, transform_indices = @transform_4, window_bounds = array<i64: 1, 16>}, {pipeline_mode = #tpu.pipeline_mode<synchronous>, transform_indices = @transform_5, window_bounds = array<i64: 1, 16>}, {pipeline_mode = #tpu.pipeline_mode<synchronous>, transform_indices = @transform_6, window_bounds = array<i64: 1, 16>}, {pipeline_mode = #tpu.pipeline_mode<synchronous>, transform_indices = @transform_7, window_bounds = array<i64: 16, 32>}, {pipeline_mode = #tpu.pipeline_mode<synchronous>, transform_indices = @transform_8, window_bounds = array<i64: 1, 32>}, {pipeline_mode = #tpu.pipeline_mode<synchronous>, transform_indices = @transform_9, window_bounds = array<i64: 1, 32>}, {pipeline_mode = #tpu.pipeline_mode<synchronous>, transform_indices = @transform_10, window_bounds = array<i64: 1, 32>}, {pipeline_mode = #tpu.pipeline_mode<synchronous>, transform_indices = @transform_11, window_bounds = array<i64: 1, 32>}, {pipeline_mode = #tpu.pipeline_mode<synchronous>, transform_indices = @transform_12, window_bounds = array<i64: 1, 32>}, {transform_indices = @transform_13, window_bounds = array<i64: 2, 2, 32>}]} {
    %c0 = arith.constant 0 : index
    %c0_0 = arith.constant 0 : index
    %c0_1 = arith.constant 0 : index
    %0 = vector.load %arg1[%c0, %c0_0, %c0_1] : memref<2x16x32xf32, #tpu.memory_space<vmem>>, vector<2x16x32xf32>
    %cst = arith.constant dense<0.000000e+00> : vector<2x32xf32>
    %1 = vector.multi_reduction <add>, %0, %cst [1] : vector<2x16x32xf32> to vector<2x32xf32>
    %2 = vector.shape_cast %1 : vector<2x32xf32> to vector<2x1x32xf32>
    %cst_2 = arith.constant 1.600000e+01 : f32
    %3 = vector.broadcast %cst_2 : f32 to vector<2x1x32xf32>
    %4 = arith.divf %2, %3 : vector<2x1x32xf32>
    %5 = vector.broadcast %4 : vector<2x1x32xf32> to vector<2x16x32xf32>
    %6 = arith.subf %0, %5 : vector<2x16x32xf32>
    %7 = arith.mulf %6, %6 : vector<2x16x32xf32>
    %cst_3 = arith.constant dense<0.000000e+00> : vector<2x32xf32>
    %8 = vector.multi_reduction <add>, %7, %cst_3 [1] : vector<2x16x32xf32> to vector<2x32xf32>
    %cst_4 = arith.constant 0.0666666701 : f32
    %9 = vector.broadcast %cst_4 : f32 to vector<2x32xf32>
    %10 = arith.mulf %8, %9 : vector<2x32xf32>
    %11 = math.sqrt %10 : vector<2x32xf32>
    %12 = vector.shape_cast %4 : vector<2x1x32xf32> to vector<2x32xf32>
    %13 = vector.shape_cast %0 : vector<2x16x32xf32> to vector<32x32xf32>
    %14 = arith.truncf %13 : vector<32x32xf32> to vector<32x32xbf16>
    %c0_5 = arith.constant 0 : index
    %c0_6 = arith.constant 0 : index
    %15 = vector.load %arg2[%c0_5, %c0_6] : memref<32x16xbf16, #tpu.memory_space<vmem>>, vector<32x16xbf16>
    %cst_7 = arith.constant dense<0.000000e+00> : vector<32x16xf32>
    %16 = tpu.matmul %14, %15, %cst_7 {dimension_numbers = #tpu.dot_dimension_numbers<[1], [0], [0], [1], [0, 0, 1, 1], [], []>} : vector<32x32xbf16>, vector<32x16xbf16>, vector<32x16xf32> -> vector<32x16xf32>
    %17 = vector.shape_cast %16 : vector<32x16xf32> to vector<2x16x16xf32>
    %18 = arith.truncf %12 : vector<2x32xf32> to vector<2x32xbf16>
    %c0_8 = arith.constant 0 : index
    %c0_9 = arith.constant 0 : index
    %19 = vector.load %arg3[%c0_8, %c0_9] : memref<32x16xbf16, #tpu.memory_space<vmem>>, vector<32x16xbf16>
    %cst_10 = arith.constant dense<0.000000e+00> : vector<2x16xf32>
    %20 = tpu.matmul %18, %19, %cst_10 {dimension_numbers = #tpu.dot_dimension_numbers<[1], [0], [0], [1], [0, 0, 1, 1], [], []>} : vector<2x32xbf16>, vector<32x16xbf16>, vector<2x16xf32> -> vector<2x16xf32>
    %21 = arith.truncf %11 : vector<2x32xf32> to vector<2x32xbf16>
    %c0_11 = arith.constant 0 : index
    %c0_12 = arith.constant 0 : index
    %22 = vector.load %arg4[%c0_11, %c0_12] : memref<32x16xbf16, #tpu.memory_space<vmem>>, vector<32x16xbf16>
    %cst_13 = arith.constant dense<0.000000e+00> : vector<2x16xf32>
    %23 = tpu.matmul %21, %22, %cst_13 {dimension_numbers = #tpu.dot_dimension_numbers<[1], [0], [0], [1], [0, 0, 1, 1], [], []>} : vector<2x32xbf16>, vector<32x16xbf16>, vector<2x16xf32> -> vector<2x16xf32>
    %24 = arith.addf %20, %23 : vector<2x16xf32>
    %25 = vector.shape_cast %24 : vector<2x16xf32> to vector<2x1x16xf32>
    %26 = vector.broadcast %25 : vector<2x1x16xf32> to vector<2x16x16xf32>
    %27 = arith.addf %17, %26 : vector<2x16x16xf32>
    %c0_14 = arith.constant 0 : index
    %c0_15 = arith.constant 0 : index
    %28 = vector.load %arg5[%c0_14, %c0_15] : memref<1x16xf32, #tpu.memory_space<vmem>>, vector<1x16xf32>
    %29 = vector.shape_cast %28 : vector<1x16xf32> to vector<1x1x16xf32>
    %30 = vector.broadcast %29 : vector<1x1x16xf32> to vector<2x16x16xf32>
    %31 = arith.addf %27, %30 : vector<2x16x16xf32>
    %cst_16 = arith.constant 0.000000e+00 : f32
    %32 = vector.broadcast %cst_16 : f32 to vector<2x16x16xf32>
    %33 = arith.maximumf %31, %32 : vector<2x16x16xf32>
    %c0_17 = arith.constant 0 : index
    %c0_18 = arith.constant 0 : index
    %34 = vector.load %arg6[%c0_17, %c0_18] : memref<1x16xf32, #tpu.memory_space<vmem>>, vector<1x16xf32>
    %35 = vector.shape_cast %34 : vector<1x16xf32> to vector<1x1x16xf32>
    %36 = vector.broadcast %35 : vector<1x1x16xf32> to vector<2x16x16xf32>
    %37 = arith.mulf %33, %36 : vector<2x16x16xf32>
    %c0_19 = arith.constant 0 : index
    %c0_20 = arith.constant 0 : index
    %38 = vector.load %arg7[%c0_19, %c0_20] : memref<1x16xf32, #tpu.memory_space<vmem>>, vector<1x16xf32>
    %39 = vector.shape_cast %38 : vector<1x16xf32> to vector<1x1x16xf32>
    %40 = vector.broadcast %39 : vector<1x1x16xf32> to vector<2x16x16xf32>
    %41 = arith.addf %37, %40 : vector<2x16x16xf32>
    %42 = math.tanh %41 : vector<2x16x16xf32>
    %43 = vector.shape_cast %42 : vector<2x16x16xf32> to vector<32x16xf32>
    %44 = arith.truncf %43 : vector<32x16xf32> to vector<32x16xbf16>
    %c0_21 = arith.constant 0 : index
    %c0_22 = arith.constant 0 : index
    %45 = vector.load %arg8[%c0_21, %c0_22] : memref<16x32xbf16, #tpu.memory_space<vmem>>, vector<16x32xbf16>
    %cst_23 = arith.constant dense<0.000000e+00> : vector<32x32xf32>
    %46 = tpu.matmul %44, %45, %cst_23 {dimension_numbers = #tpu.dot_dimension_numbers<[1], [0], [0], [1], [0, 0, 1, 1], [], []>} : vector<32x16xbf16>, vector<16x32xbf16>, vector<32x32xf32> -> vector<32x32xf32>
    %47 = vector.shape_cast %46 : vector<32x32xf32> to vector<2x16x32xf32>
    %c0_24 = arith.constant 0 : index
    %c0_25 = arith.constant 0 : index
    %48 = vector.load %arg9[%c0_24, %c0_25] : memref<1x32xf32, #tpu.memory_space<vmem>>, vector<1x32xf32>
    %49 = vector.shape_cast %48 : vector<1x32xf32> to vector<1x1x32xf32>
    %50 = vector.broadcast %49 : vector<1x1x32xf32> to vector<2x16x32xf32>
    %51 = arith.addf %47, %50 : vector<2x16x32xf32>
    %cst_26 = arith.constant dense<0xFF800000> : vector<2x32xf32>
    %52 = vector.multi_reduction <maximumf>, %51, %cst_26 [1] : vector<2x16x32xf32> to vector<2x32xf32>
    %53 = vector.shape_cast %52 : vector<2x32xf32> to vector<2x1x32xf32>
    %54 = vector.broadcast %53 : vector<2x1x32xf32> to vector<2x16x32xf32>
    %55 = arith.subf %51, %54 : vector<2x16x32xf32>
    %56 = math.exp %55 : vector<2x16x32xf32>
    %cst_27 = arith.constant dense<0.000000e+00> : vector<2x32xf32>
    %57 = vector.multi_reduction <add>, %56, %cst_27 [1] : vector<2x16x32xf32> to vector<2x32xf32>
    %58 = vector.shape_cast %57 : vector<2x32xf32> to vector<2x1x32xf32>
    %59 = vector.broadcast %58 : vector<2x1x32xf32> to vector<2x16x32xf32>
    %60 = arith.divf %56, %59 : vector<2x16x32xf32>
    %61 = arith.mulf %0, %60 : vector<2x16x32xf32>
    %cst_28 = arith.constant dense<0.000000e+00> : vector<2x32xf32>
    %62 = vector.multi_reduction <add>, %61, %cst_28 [1] : vector<2x16x32xf32> to vector<2x32xf32>
    %63 = arith.mulf %61, %0 : vector<2x16x32xf32>
    %cst_29 = arith.constant dense<0.000000e+00> : vector<2x32xf32>
    %64 = vector.multi_reduction <add>, %63, %cst_29 [1] : vector<2x16x32xf32> to vector<2x32xf32>
    %65 = arith.mulf %62, %62 : vector<2x32xf32>
    %66 = arith.subf %64, %65 : vector<2x32xf32>
    %cst_30 = arith.constant 9.99999974E-5 : f32
    %67 = vector.broadcast %cst_30 : f32 to vector<2x32xf32>
    %68 = arith.maximumf %66, %67 : vector<2x32xf32>
    %69 = math.sqrt %68 : vector<2x32xf32>
    %c0_31 = arith.constant 0 : index
    %c0_32 = arith.constant 0 : index
    %70 = vector.load %arg10[%c0_31, %c0_32] : memref<1x32xf32, #tpu.memory_space<vmem>>, vector<1x32xf32>
    %71 = vector.broadcast %70 : vector<1x32xf32> to vector<2x32xf32>
    %72 = arith.mulf %62, %71 : vector<2x32xf32>
    %c0_33 = arith.constant 0 : index
    %c0_34 = arith.constant 0 : index
    %73 = vector.load %arg11[%c0_33, %c0_34] : memref<1x32xf32, #tpu.memory_space<vmem>>, vector<1x32xf32>
    %74 = vector.broadcast %73 : vector<1x32xf32> to vector<2x32xf32>
    %75 = arith.addf %72, %74 : vector<2x32xf32>
    %c0_35 = arith.constant 0 : index
    %c0_36 = arith.constant 0 : index
    %c0_37 = arith.constant 0 : index
    %76 = vector.load %arg14[%c0_35, %c0_36, %c0_37] : memref<2x2x32xf32, #tpu.memory_space<vmem>>, vector<2x1x32xf32>
    %77 = vector.shape_cast %76 : vector<2x1x32xf32> to vector<2x32xf32>
    %78 = vector.shape_cast %75 : vector<2x32xf32> to vector<2x1x32xf32>
    tpu.vector_store %arg14[%c0_35, %c0_36, %c0_37], %78 {strides = array<i32>} : memref<2x2x32xf32, #tpu.memory_space<vmem>>, vector<2x1x32xf32>,
    %c0_38 = arith.constant 0 : index
    %c0_39 = arith.constant 0 : index
    %79 = vector.load %arg12[%c0_38, %c0_39] : memref<1x32xf32, #tpu.memory_space<vmem>>, vector<1x32xf32>
    %80 = vector.broadcast %79 : vector<1x32xf32> to vector<2x32xf32>
    %81 = arith.mulf %69, %80 : vector<2x32xf32>
    %c0_40 = arith.constant 0 : index
    %c0_41 = arith.constant 0 : index
    %82 = vector.load %arg13[%c0_40, %c0_41] : memref<1x32xf32, #tpu.memory_space<vmem>>, vector<1x32xf32>
    %83 = vector.broadcast %82 : vector<1x32xf32> to vector<2x32xf32>
    %84 = arith.addf %81, %83 : vector<2x32xf32>
    %c0_42 = arith.constant 0 : index
    %c1 = arith.constant 1 : index
    %c0_43 = arith.constant 0 : index
    %85 = vector.load %arg14[%c0_42, %c1, %c0_43] : memref<2x2x32xf32, #tpu.memory_space<vmem>>, vector<2x1x32xf32>
    %86 = vector.shape_cast %85 : vector<2x1x32xf32> to vector<2x32xf32>
    %87 = vector.shape_cast %84 : vector<2x32xf32> to vector<2x1x32xf32>
    tpu.vector_store %arg14[%c0_42, %c1, %c0_43], %87 {strides = array<i32>} : memref<2x2x32xf32, #tpu.memory_space<vmem>>, vector<2x1x32xf32>,
    return
  }
  func.func @transform_0(%arg0: i32) -> (i32, i32, i32) {
    %c0_i32 = arith.constant 0 : i32
    %c0_i32_0 = arith.constant 0 : i32
    %c0_i32_1 = arith.constant 0 : i32
    return %arg0, %c0_i32, %c0_i32_0 : i32, i32, i32
  }
  func.func @transform_1(%arg0: i32) -> (i32, i32) {
    %c0_i32 = arith.constant 0 : i32
    %c0_i32_0 = arith.constant 0 : i32
    %c0_i32_1 = arith.constant 0 : i32
    return %c0_i32, %c0_i32_0 : i32, i32
  }
  func.func @transform_2(%arg0: i32) -> (i32, i32) {
    %c0_i32 = arith.constant 0 : i32
    %c0_i32_0 = arith.constant 0 : i32
    %c0_i32_1 = arith.constant 0 : i32
    return %c0_i32, %c0_i32_0 : i32, i32
  }
  func.func @transform_3(%arg0: i32) -> (i32, i32) {
    %c0_i32 = arith.constant 0 : i32
    %c0_i32_0 = arith.constant 0 : i32
    %c0_i32_1 = arith.constant 0 : i32
    return %c0_i32, %c0_i32_0 : i32, i32
  }
  func.func @transform_4(%arg0: i32) -> (i32, i32) {
    %c0_i32 = arith.constant 0 : i32
    %c0_i32_0 = arith.constant 0 : i32
    %c0_i32_1 = arith.constant 0 : i32
    return %c0_i32, %c0_i32_0 : i32, i32
  }
  func.func @transform_5(%arg0: i32) -> (i32, i32) {
    %c0_i32 = arith.constant 0 : i32
    %c0_i32_0 = arith.constant 0 : i32
    %c0_i32_1 = arith.constant 0 : i32
    return %c0_i32, %c0_i32_0 : i32, i32
  }
  func.func @transform_6(%arg0: i32) -> (i32, i32) {
    %c0_i32 = arith.constant 0 : i32
    %c0_i32_0 = arith.constant 0 : i32
    %c0_i32_1 = arith.constant 0 : i32
    return %c0_i32, %c0_i32_0 : i32, i32
  }
  func.func @transform_7(%arg0: i32) -> (i32, i32) {
    %c0_i32 = arith.constant 0 : i32
    %c0_i32_0 = arith.constant 0 : i32
    %c0_i32_1 = arith.constant 0 : i32
    return %c0_i32, %c0_i32_0 : i32, i32
  }
  func.func @transform_8(%arg0: i32) -> (i32, i32) {
    %c0_i32 = arith.constant 0 : i32
    %c0_i32_0 = arith.constant 0 : i32
    %c0_i32_1 = arith.constant 0 : i32
    return %c0_i32, %c0_i32_0 : i32, i32
  }
  func.func @transform_9(%arg0: i32) -> (i32, i32) {
    %c0_i32 = arith.constant 0 : i32
    %c0_i32_0 = arith.constant 0 : i32
    %c0_i32_1 = arith.constant 0 : i32
    return %c0_i32, %c0_i32_0 : i32, i32
  }
  func.func @transform_10(%arg0: i32) -> (i32, i32) {
    %c0_i32 = arith.constant 0 : i32
    %c0_i32_0 = arith.constant 0 : i32
    %c0_i32_1 = arith.constant 0 : i32
    return %c0_i32, %c0_i32_0 : i32, i32
  }
  func.func @transform_11(%arg0: i32) -> (i32, i32) {
    %c0_i32 = arith.constant 0 : i32
    %c0_i32_0 = arith.constant 0 : i32
    %c0_i32_1 = arith.constant 0 : i32
    return %c0_i32, %c0_i32_0 : i32, i32
  }
  func.func @transform_12(%arg0: i32) -> (i32, i32) {
    %c0_i32 = arith.constant 0 : i32
    %c0_i32_0 = arith.constant 0 : i32
    %c0_i32_1 = arith.constant 0 : i32
    return %c0_i32, %c0_i32_0 : i32, i32
  }
  func.func @transform_13(%arg0: i32) -> (i32, i32, i32) {
    %c0_i32 = arith.constant 0 : i32
    %c0_i32_0 = arith.constant 0 : i32
    %c0_i32_1 = arith.constant 0 : i32
    return %arg0, %c0_i32, %c0_i32_0 : i32, i32, i32
  }
}

</mosaic_0001>

<bundles_post_ra>
// kernel: tpu_custom_call.1
= control target key start
LH: loop header
LB: loop body
LE: loop exit
PB: predicated region body
PF: predicated region fallthrough
CT: control target
= control target key end

     0   :  { %s1713_s0 = inlined_call_operand.vmem [shape: f32[4,16,32], index: 0, kind: input, shape index: {}]   ;;  %s1714_s1 = inlined_call_operand.vmem [shape: bf16[32,16], index: 1, kind: input, shape index: {}]   ;;  %s1715_s2 = inlined_call_operand.vmem [shape: bf16[32,16], index: 2, kind: input, shape index: {}]   ;;  %s1716_s3 = inlined_call_operand.vmem [shape: bf16[32,16], index: 3, kind: input, shape index: {}]   ;;  %s1717_s4 = inlined_call_operand.vmem [shape: f32[1,16], index: 4, kind: input, shape index: {}]   ;;  %s1718_s5 = inlined_call_operand.hbm [shape: f32[1,16], index: 5, kind: input, shape index: {}]   ;;  %s1719_s6 = inlined_call_operand.vmem [shape: f32[1,16], index: 6, kind: input, shape index: {}]   ;;  %s1720_s7 = inlined_call_operand.vmem [shape: bf16[16,32], index: 7, kind: input, shape index: {}]   ;;  %s1721_s8 = inlined_call_operand.vmem [shape: f32[1,32], index: 8, kind: input, shape index: {}]   ;;  %s1722_s9 = inlined_call_operand.vmem [shape: f32[1,32], index: 9, kind: input, shape index: {}]   ;;  %s1723_s10 = inlined_call_operand.vmem [shape: f32[1,32], index: 10, kind: input, shape index: {}]   ;;  %s1724_s11 = inlined_call_operand.vmem [shape: f32[1,32], index: 11, kind: input, shape index: {}]   ;;  %s1725_s12 = inlined_call_operand.vmem [shape: f32[1,32], index: 12, kind: input, shape index: {}]   ;;  %s1726_s13 = inlined_call_operand.hbm [shape: f32[4,2,32], index: 13, kind: output, shape index: {}]  }
   0x1   :  { %1727 = sst [smem:[#allocation8_spill]] %s1713_s0 }
   0x2   :  { %1728 = sst [smem:[#allocation9_spill]] %s1714_s1 }
   0x3   :  { %1729 = sst [smem:[#allocation10_spill]] %s1718_s5 }
   0x4   :  { %18 = vsyncpa [#allocation3], 0 }
   0x5   :  { %19 = vsyncpa [#allocation4], 0 }
   0x6   :  { %21 = vsyncpa [#allocation4 + $0x1], 0  ;;  %s1477_s25 = smov 0   ;;  %s1479_s26 = smov 0  }
   0x7   :  { %s1481_s27 = smov 0   ;;  %s1483_s28 = smov 0  }
   0x8 LB: > { %s1498_s29 = sadd.s32 4294967295, %s1398_s28   ;;  %s1137_s30 = sadd.s32 4294967294, %s1398_s28   ;;  %s1398_s28 = sphi %s1483_s28, %s1739_s28   ;;  %s1394_s27 = sphi %s1481_s27, %s1738_s27   ;;  %s1390_s26 = sphi %s1479_s26, %s1737_s26   ;;  %s1386_s25 = sphi %s1477_s25, %s1736_s25  }
   0x9   : > { %s1502_s14 = sadd.s32 1, %s1398_s28   ;;  %s312_s15 = sadd.s32 1, %s1394_s27 }
   0xa   : > { %s309_s16 = ssub.s32 %s1398_s28, %s1502_s14  ;;  %p322_p0 = scmp.ne.s32.totalorder %s1394_s27, %s1390_s26 }
   0xb   : > { %p310_p1 = scmp.eq.s32.totalorder %s309_s16, 0  ;;  %p323_p2 = scmp.eq.s32.totalorder %s1498_s29, 1 }
   0xc   : > { %p328_p3 = scmp.ne.s32.totalorder %s1390_s26, %s1386_s25  ;;  %p329_p4 = scmp.eq.s32.totalorder %s1137_s30, 1 }
   0xd   : > { %s1513_s17 = scalar_select %p310_p1, %s1394_s27, %s312_s15  }
   0xe   : > { %p1515_p5 = por %p323_p2, %p322_p0  ;;  %p1519_p6 = por %p329_p4, %p328_p3 }
   0xf   : > { %p1138_p7 = scmp.ge.s32.totalorder %s1398_s28, 1  ;;  %p336_p8 = scmp.lt.s32.totalorder %s1398_s28, 3 }
  0x10   : > { %p1232_p9 = scmp.eq.s32.totalorder %s1498_s29, 0  ;;  %s1400_s21 = smov [#allocation2]  }
  0x11   : > { %p1526_p10 = pnand %p1138_p7, %p336_p8  ;;  %s361_s22 = sshll.u32 %s1400_s21, 4  ;;  %s362_s22 = int_to_ptr.vmem [resolvable:$true] %s361_s22 }
  0x12   : > { %s1319_s23 = scalar_lea.vmem %s362_s22, 16  ;;  %s1326_s24 = scalar_lea.vmem %s362_s22, 32 }
  0x13   : > { %p1224_p11 = pneg %p1526_p10  ;;  %p1320_p0 = scmp.ne.s32.totalorder %s362_s22, %s1319_s23 }
  0x14   : > { %p1327_p3 = scmp.lt.s32.totalorder %s362_s22, %s362_s22  ;;  %p1328_p4 = scmp.lt.s32.totalorder %s1326_s24, %s1319_s23 }
  0x15   : > { %p1225_p12 = pnand %p1232_p9, %p1224_p11 }
  0x16   : > { %p1329_p7 = por %p1328_p4, %p1327_p3 }
  0x17   : > { %p1310_p13 = pneg %p1225_p12 }
  0x19   : > { %p1322_p1 = pnand %p1320_p0, %p1310_p13 }
  0x1b   : > { %p1323_p2 = pneg %p1322_p1 }
  0x1d   : > { %p1330_p8 = pnand %p1329_p7, %p1323_p2 }
  0x1f   : > { %1333 = shalt.err (!%p1330_p8)
}
  0x20   : > { %s1733_s5 = sld [smem:[#allocation10_spill]] }
  0x22   : > { %405 = sbr.rel (%p1526_p10) target bundleno = 670 (0x29e), region = 72 }
  0x26   : > { %1227 = dma.hbm_to_vmem [thread:$0]  (!%p1225_p12), %s1733_s5, 16, %s362_s22, [#allocation3]  }
  0x27   : > { %1377 = dma.done.wait (%p1232_p9), [#allocation3], 16  }
  0x28   : > { %1379 = vsyncadd (%p1232_p9), [#allocation3], 4294967280  ;;  %s1144_s16 = sshll.u32 %s1498_s29, 1  ;;  %v1401_v0 = vmov 0.0   ;;  %vm1402_vm0 = vmmov 0   ;;  %s1734_s0 = sld [smem:[#allocation8_spill]] }
  0x29   : > { %p451_p11 = scmp.lt.s32.totalorder %s1144_s16, 3  ;;  %1196 = vmatprep.subr.bf16.mxu1 %v1401_v0  ;;  %1200 = vmatprep.mubr.msk.bf16.mxu1 %vm1402_vm0, %v1401_v0  ;;  %s1735_s1 = sld [smem:[#allocation9_spill]]  ;;  %vm463_vm1 = vcmask 261120   ;;  %v1277_v16 = vld [vmem:[%s1716_s3 + $0x8] sm:$0xff]   ;;  %v1278_v20 = vld [vmem:[%s1716_s3] sm:$0xff]   ;;  %vm616_vm2 = vcmask 1041409  }
  0x2a   : > { %v1275_v18 = vld [vmem:[%s1715_s2 + $0x8] sm:$0xff]   ;;  %1197 = vmatpush3.bf16.msra.mxu1 %v1277_v16  ;;  %v1276_v24 = vld [vmem:[%s1715_s2] sm:$0xff]   ;;  %vm823_vm7 = vcmask 130048   ;;  %s447_s30 = sand.u32 1, %s1390_s26   ;;  %vm1026_vm8 = vcmask 253952   ;;  %s1404_s5 = smov [#allocation5]  }
  0x2b   : > { %s1741_s16 = smov (!%p451_p11, %s1144_s16), 3  ;;  %1198 = vmatprep.subr.bf16.mxu1 %v1401_v0  ;;  %s1338_s22 = sshll.u32 %s1404_s5, 4  ;;  %s1339_s22 = int_to_ptr.vmem [resolvable:$false] %s1338_s22 }
  0x2c   : > { %s1173_s21 = sshll.u32 %s1741_s16, 4  ;;  %s1143_s16 = sshll.u32 %s447_s30, 2 }
  0x2d   : > { %s1646_s23 = scalar_lea.vmem [#allocation5], %s1143_s16  ;;  %s1174_s16 = sshll.u32 %s1498_s29, 6 }
  0x2e   : > { %s455_s20 = scalar_lea.vmem %s1734_s0, %s1173_s21  ;;  %1199 = vmatpush3.bf16.msra.mxu1 %v1278_v20  ;;  %s1063_s21 = sshll.u32 %s1646_s23, 4  ;;  %s1667_s21 = int_to_ptr.vmem [resolvable:$true] %s1063_s21 }
  0x2f   : > { %v1273_v1 = vld [vmem:[%s1735_s1 + $0x8] sm:$0xff]   ;;  %v1274_v2 = vld [vmem:[%s1735_s1] sm:$0xff]   ;;  %v1558_v5 = vld [vmem:[%s455_s20 + $0x10] sm:$0xff]  ;;  %s1665_s24 = scalar_lea.hbm %s1726_s13, %s1174_s16  ;;  %s1673_s29 = scalar_lea.sflag [#allocation4], %s447_s30 }
  0x30   : > { %1188 = vmatprep.subr.bf16.mxu0 %v1273_v1  ;;  %v1554_v3 = vld [vmem:[%s455_s20] sm:$0xff]  ;;  %v1556_v4 = vld [vmem:[%s455_s20 + $0x8] sm:$0xff]  ;;  %v1566_v9 = vld [vmem:[%s455_s20 + $0x18] sm:$0xff]  ;;  %v473_v10 = vsel %vm463_vm1, %v1558_v5, 0.0  ;;  %s1334_s15 = scalar_lea.vmem %s1667_s21, 64  ;;  %s1340_s16 = scalar_lea.vmem %s1339_s22, 128 }
  0x31   : > { %1189 = vmatpush3.bf16.msra.mxu0 %v1273_v1  ;;  %v464_v6 = vsel %vm463_vm1, %v1554_v3, 0.0  ;;  %v465_v7 = vsel %vm463_vm1, %v1556_v4, 0.0  ;;  %v527_v8 = vpack.c.bf16 %v1556_v4, %v1554_v3  ;;  %v474_v12 = vsel %vm463_vm1, %v1566_v9, 0.0  ;;  %p1335_p9 = scmp.ne.s32.totalorder %s1667_s21, %s1334_s15  ;;  %p1341_p13 = scmp.lt.s32.totalorder %s1667_s21, %s1339_s22 }
  0x32   : > { %1190 = vmatprep.subr.bf16.mxu0 %v1274_v2  ;;  %v466_v11 = vadd.f32 %v465_v7, %v464_v6  ;;  %v475_v13 = vadd.f32 %v474_v12, %v473_v10  ;;  %v528_v15 = vpack.c.bf16 %v1566_v9, %v1558_v5  ;;  %p1342_p0 = scmp.lt.s32.totalorder %s1340_s16, %s1334_s15 }
  0x33   : > { %1192 = vmatprep.mubr.msk.bf16.mxu0 %vm463_vm1, %v527_v8  ;;  %p1336_p10 = pnand %p1335_p9, %p1515_p5 }
  0x34   : > { %v467_v14 = vrot.slane %v466_v11, 4  ;;  %v476_v17 = vrot.slane %v475_v13, 4  ;;  %p1343_p1 = por %p1342_p0, %p1341_p13 }
  0x35   : > { %1191 = vmatpush3.bf16.msra.mxu0 %v1274_v2  ;;  %p1337_p12 = pneg %p1336_p10 }
  0x36   : > { %v468_v19 = vadd.f32 %v467_v14, %v466_v11  ;;  %1204 = vmatprep.subr.bf16.mxu0 %v1401_v0  ;;  %v477_v21 = vadd.f32 %v476_v17, %v475_v13 }
  0x37   : > { %p1344_p2 = pnand %p1343_p1, %p1337_p12 }
  0x38   : > { %v469_v22 = vrot.slane %v468_v19, 2  ;;  %1193 = vmatmul.mubr.msk.bf16.vlgmr.msra.gmra.mxu0 %vm463_vm1, %v528_v15  ;;  %v478_v23 = vrot.slane %v477_v21, 2 }
  0x39   : > { %1205 = vmatpush3.bf16.msra.mxu0 %v1275_v18  ;;  %1208 = vmatprep.mubr.msk.bf16.mxu0 %vm1402_vm0, %v1401_v0 }
  0x3a   : > { %v470_v25 = vadd.f32 %v469_v22, %v468_v19  ;;  %1206 = vmatprep.subr.bf16.mxu0 %v1401_v0  ;;  %v479_v26 = vadd.f32 %v478_v23, %v477_v21  ;;  %v1279_v23 = vld [vmem:[%s1720_s7] sm:$0xff]  }
  0x3b   : > { %1212 = vmatprep.subr.bf16.mxu1 %v1279_v23 }
  0x3c   : > { %v471_v27 = vrot.slane %v470_v25, 1  ;;  %v480_v28 = vrot.slane %v479_v26, 1 }
  0x3d   : > { %1207 = vmatpush3.bf16.msra.mxu0 %v1276_v24 }
  0x3e   : > { %v472_v29 = vadd.f32 %v471_v27, %v470_v25  ;;  %v481_v30 = vadd.f32 %v480_v28, %v479_v26 }
  0x40   : > { %v483_v31 = vmul.f32 0.0625, %v472_v29  ;;  %v484_v32 = vmul.f32 0.0625, %v481_v30 }
  0x42   : > { %v485_v33 = vsub.f32 %v1554_v3, %v483_v31  ;;  %v486_v34 = vsub.f32 %v1556_v4, %v483_v31  ;;  %v600_v35 = vpack.c.bf16 %v483_v31, %v483_v31  ;;  %v487_v36 = vsub.f32 %v1558_v5, %v484_v32 }
  0x43   : > { %v488_v37 = vsub.f32 %v1566_v9, %v484_v32  ;;  %v601_v38 = vpack.c.bf16 %v484_v32, %v484_v32  ;;  %v1403_v32 = vmov 1966171168  }
  0x44   : > { %v489_v39 = vmul.f32 %v485_v33, %v485_v33  ;;  %v490_v40 = vmul.f32 %v486_v34, %v486_v34  ;;  %v676_v41 = vunpack.c.l.b16 %v600_v35  ;;  %v491_v42 = vmul.f32 %v487_v36, %v487_v36 }
  0x45   : > { %v492_v43 = vmul.f32 %v488_v37, %v488_v37  ;;  %v677_v44 = vunpack.c.l.b16 %v601_v38  ;;  %v737_v33 = vunpack.c.l.s4 %v1403_v32  ;;  %v739_v34 = vlaneseq }
  0x46   : > { %v493_v45 = vsel %vm463_vm1, %v489_v39, 0.0  ;;  %v494_v46 = vsel %vm463_vm1, %v490_v40, 0.0  ;;  %v502_v48 = vsel %vm463_vm1, %v491_v42, 0.0 }
  0x47   : > { %v495_v47 = vadd.f32 %v494_v46, %v493_v45  ;;  %v503_v49 = vsel %vm463_vm1, %v492_v43, 0.0  ;;  %v678_v50 = vsel %vm616_vm2, %v677_v44, %v676_v41  ;;  %v738_v35 = vunpack.c.0.s8 %v737_v33 }
  0x48   : > { %v504_v51 = vadd.f32 %v503_v49, %v502_v48  ;;  %v679_v52 = vpack.c.b16 %v678_v50, %v678_v50  ;;  %v740_v36 = vshrl.u32 %v739_v34, 7  ;;  %v1157_v49 = vld [vmem:[%s1717_s4] ss:$0 sm:$0xff] }
  0x49   : > { %v496_v53 = vrot.slane %v495_v47, 4 }
  0x4a   : > { %v505_v54 = vrot.slane %v504_v51, 4  ;;  %1209 = vmatmul.mubr.msk.bf16.vlgmr.msra.gmra.mxu0 %vm463_vm1, %v679_v52  ;;  %v741_v37 = vsub.s32 %v738_v35, %v740_v36  ;;  %v760_v42 = vsub.s32 0, %v740_v36 }
  0x4b   : > { %v497_v55 = vadd.f32 %v496_v53, %v495_v47 }
  0x4c   : > { %v506_v56 = vadd.f32 %v505_v54, %v504_v51 }
  0x4d   : > { %v498_v57 = vrot.slane %v497_v55, 2 }
  0x4e   : > { %v507_v58 = vrot.slane %v506_v56, 2 }
  0x4f   : > { %v499_v59 = vadd.f32 %v498_v57, %v497_v55  ;;  %v1158_v57 = vld [vmem:[#allocation2] ss:$0 sm:$0xff] }
  0x50   : > { %v508_v60 = vadd.f32 %v507_v58, %v506_v56 }
  0x51   : > { %v500_v61 = vrot.slane %v499_v59, 1 }
  0x52   : > { %v509_v62 = vrot.slane %v508_v60, 1 }
  0x53   : > { %v501_v63 = vadd.f32 %v500_v61, %v499_v59 }
  0x54   : > { %v510_v0 = vadd.f32 %v509_v62, %v508_v60  ;;  %v1159_v62 = vld [vmem:[%s1719_s6] ss:$0 sm:$0xff] }
  0x55   : > { %v511_v1 = vmul.f32 0.06666667, %v501_v63 }
  0x56   : > { %v512_v2 = vmul.f32 0.06666667, %v510_v0 }
  0x57   : > { %1280 = vrsqrt.f32 %v511_v1  ;;  %vm515_vm3 = vcmp.eq.f32.partialorder %v511_v1, inf  ;;  %v518_v7 = vand.u32 2147483648, %v511_v1  ;;  %vm517_vm4 = vcmp.eq.f32.partialorder %v511_v1, 0.0 }
  0x58   : > { %1282 = vrsqrt.f32 %v512_v2  ;;  %vm522_vm5 = vcmp.eq.f32.partialorder %v512_v2, inf  ;;  %v525_v11 = vand.u32 2147483648, %v512_v2  ;;  %vm524_vm6 = vcmp.eq.f32.partialorder %v512_v2, 0.0 }
  0x64   : > { %v1281_v6 = vpop.eup %1280 }
  0x65   : > { %v1283_v8 = vpop.eup %1282  ;;  %v514_v10 = vmul.f32 %v1281_v6, %v511_v1 }
  0x66   : > { %v521_v12 = vmul.f32 %v1283_v8, %v512_v2 }
  0x67   : > { %v516_v13 = vsel %vm515_vm3, %v511_v1, %v514_v10 }
  0x68   : > { %v519_v14 = vsel %vm517_vm4, %v518_v7, %v516_v13  ;;  %v523_v15 = vsel %vm522_vm5, %v512_v2, %v521_v12 }
  0x69   : > { %v526_v16 = vsel %vm524_vm6, %v525_v11, %v523_v15  ;;  %v606_v17 = vpack.c.bf16 %v519_v14, %v519_v14 }
  0x6a   : > { %v607_v18 = vpack.c.bf16 %v526_v16, %v526_v16 }
  0x6b   : > { %v614_v19 = vunpack.c.l.b16 %v606_v17 }
  0x6c   : > { %v615_v20 = vunpack.c.l.b16 %v607_v18 }
  0x6e   : > { %v617_v21 = vsel %vm616_vm2, %v615_v20, %v614_v19  ;;  %v1163_v20 = vld [vmem:[%s1721_s8] ss:$0 sm:$0xff] }
  0x6f   : > { %v618_v22 = vpack.c.b16 %v617_v21, %v617_v21 }
  0x71   : > { %1201 = vmatmul.mubr.msk.bf16.vlgmr.msra.gmra.mxu1 %vm463_vm1, %v618_v22 }
  0x72   : > { %1213 = vmatpush3.bf16.msra.mxu1 %v1279_v23 }
  0xf8   : > { %v1194_v24 = vpop.f32.mrf.mxu0 }
  0xfa   : > { %v585_v25 = vpop.f32.mrf.mxu0 }
  0xfc   : > { %v1195_v26 = vpop.f32.mrf.mxu0 }
  0xfe   : > { %v588_v27 = vpop.f32.mrf.mxu0 }
 0x10a   : > { %v729_v28 = vpop.f32.mrf.mxu0 }
 0x10c   : > { %v1210_v29 = vpop.f32.mrf.mxu0 }
 0x10e   : > { %v732_v30 = vpop.f32.mrf.mxu0 }
 0x110   : > { %v1211_v31 = vpop.f32.mrf.mxu0 }
 0x131   : > { %v668_v38 = vpop.f32.mrf.mxu1 }
 0x132   : > { %v730_v39 = vadd.f32 %v729_v28, %v668_v38 }
 0x133   : > { %v1202_v40 = vpop.f32.mrf.mxu1 }
 0x134   : > { %v742_v41 = vrot.slane %v730_v39, %v741_v37 }
 0x135   : > { %v671_v43 = vpop.f32.mrf.mxu1 }
 0x136   : > { %v743_v44 = vcombine.high %v742_v41, %v742_v41  ;;  %v750_v45 = vrot.slane %v742_v41, %v741_v37 }
 0x137   : > { %v1203_v46 = vpop.f32.mrf.mxu1 }
 0x138   : > { %v757_v47 = vrot.slane %v743_v44, %v741_v37  ;;  %v761_v48 = vrot.slane %v750_v45, %v760_v42 }
 0x13a   : > { %v765_v50 = vrot.slane %v757_v47, %v760_v42  ;;  %v768_v51 = vadd.f32 %v761_v48, %v585_v25  ;;  %v769_v52 = vadd.f32 %v761_v48, %v588_v27 }
 0x13c   : > { %v770_v53 = vadd.f32 %v1194_v24, %v765_v50  ;;  %v771_v54 = vadd.f32 %v1195_v26, %v765_v50  ;;  %v779_v55 = vadd.f32 %v1157_v49, %v768_v51  ;;  %v780_v56 = vadd.f32 %v1157_v49, %v769_v52 }
 0x13e   : > { %v781_v58 = vadd.f32 %v1157_v49, %v770_v53  ;;  %v782_v59 = vadd.f32 %v1157_v49, %v771_v54  ;;  %v783_v60 = vmax.f32 %v779_v55, 0.0  ;;  %v784_v61 = vmax.f32 %v780_v56, 0.0 }
 0x140   : > { %v785_v63 = vmax.f32 %v781_v58, 0.0  ;;  %v786_v0 = vmax.f32 %v782_v59, 0.0  ;;  %v794_v1 = vmul.f32 %v1158_v57, %v783_v60  ;;  %v795_v2 = vmul.f32 %v1158_v57, %v784_v61 }
 0x142   : > { %v796_v6 = vmul.f32 %v1158_v57, %v785_v63  ;;  %v797_v7 = vmul.f32 %v1158_v57, %v786_v0  ;;  %v805_v8 = vadd.f32 %v1159_v62, %v794_v1  ;;  %v806_v10 = vadd.f32 %v1159_v62, %v795_v2 }
 0x144   : > { %v807_v11 = vadd.f32 %v1159_v62, %v796_v6  ;;  %v808_v12 = vadd.f32 %v1159_v62, %v797_v7  ;;  %1284 = vtanh.f32 %v805_v8 }
 0x145   : > { %1286 = vtanh.f32 %v806_v10 }
 0x146   : > { %1288 = vtanh.f32 %v807_v11 }
 0x147   : > { %1290 = vtanh.f32 %v808_v12 }
 0x151   : > { %v1285_v13 = vpop.eup %1284 }
 0x152   : > { %v1287_v14 = vpop.eup %1286 }
 0x153   : > { %v1289_v15 = vpop.eup %1288  ;;  %v813_v16 = vpack.c.bf16 %v1287_v14, %v1285_v13 }
 0x154   : > { %v1291_v17 = vpop.eup %1290 }
 0x155   : > { %1214 = vmatprep.mubr.msk.bf16.mxu1 %vm823_vm7, %v813_v16  ;;  %v814_v18 = vpack.c.bf16 %v1291_v17, %v1289_v15 }
 0x157   : > { %1215 = vmatmul.mubr.msk.bf16.vlgmr.msra.gmra.mxu1 %vm823_vm7, %v814_v18 }
 0x217   : > { %v1216_v19 = vpop.f32.mrf.mxu1 }
 0x218   : > { %v888_v22 = vadd.f32 %v1216_v19, %v1163_v20 }
 0x219   : > { %v864_v21 = vpop.f32.mrf.mxu1 }
 0x21a   : > { %v886_v24 = vadd.f32 %v1163_v20, %v864_v21  ;;  %v899_v27 = vsel %vm463_vm1, %v888_v22, -inf }
 0x21b   : > { %v1217_v23 = vpop.f32.mrf.mxu1 }
 0x21c   : > { %v889_v25 = vadd.f32 %v1217_v23, %v1163_v20  ;;  %v890_v31 = vsel %vm463_vm1, %v886_v24, -inf }
 0x21d   : > { %v867_v26 = vpop.f32.mrf.mxu1 }
 0x21e   : > { %v900_v28 = vsel %vm463_vm1, %v889_v25, -inf  ;;  %v887_v29 = vadd.f32 %v1163_v20, %v867_v26 }
 0x21f   : > { %v901_v30 = vmax.f32 %v899_v27, %v900_v28 }
 0x220   : > { %v891_v32 = vsel %vm463_vm1, %v887_v29, -inf }
 0x221   : > { %v902_v33 = vrot.slane %v901_v30, 4  ;;  %v892_v34 = vmax.f32 %v890_v31, %v891_v32 }
 0x223   : > { %v903_v35 = vmax.f32 %v901_v30, %v902_v33  ;;  %v893_v36 = vrot.slane %v892_v34, 4 }
 0x225   : > { %v904_v37 = vrot.slane %v903_v35, 2  ;;  %v894_v38 = vmax.f32 %v892_v34, %v893_v36 }
 0x227   : > { %v905_v39 = vmax.f32 %v903_v35, %v904_v37  ;;  %v895_v40 = vrot.slane %v894_v38, 2 }
 0x229   : > { %v906_v41 = vrot.slane %v905_v39, 1  ;;  %v896_v42 = vmax.f32 %v894_v38, %v895_v40 }
 0x22b   : > { %v907_v43 = vmax.f32 %v905_v39, %v906_v41  ;;  %v897_v44 = vrot.slane %v896_v42, 1 }
 0x22d   : > { %v910_v45 = vsub.f32 %v888_v22, %v907_v43  ;;  %v911_v46 = vsub.f32 %v889_v25, %v907_v43  ;;  %v898_v47 = vmax.f32 %v896_v42, %v897_v44 }
 0x22f   : > { %v916_v48 = vmul.f32 1.442695, %v910_v45  ;;  %v918_v49 = vmul.f32 1.442695, %v911_v46  ;;  %v908_v50 = vsub.f32 %v886_v24, %v898_v47  ;;  %v909_v51 = vsub.f32 %v887_v29, %v898_v47 }
 0x231   : > { %1292 = vpow2.f32 %v916_v48  ;;  %v912_v52 = vmul.f32 1.442695, %v908_v50  ;;  %v914_v53 = vmul.f32 1.442695, %v909_v51 }
 0x232   : > { %1294 = vpow2.f32 %v918_v49 }
 0x233   : > { %1296 = vpow2.f32 %v912_v52  ;;  %v1164_v52 = vld [vmem:[%s1722_s9] ss:$0 sm:$0xff] }
 0x234   : > { %1298 = vpow2.f32 %v914_v53 }
 0x23e   : > { %v1293_v54 = vpop.eup %1292 }
 0x23f   : > { %v1295_v55 = vpop.eup %1294  ;;  %v929_v56 = vsel %vm463_vm1, %v1293_v54, 0.0 }
 0x240   : > { %v1297_v57 = vpop.eup %1296  ;;  %v930_v58 = vsel %vm463_vm1, %v1295_v55, 0.0 }
 0x241   : > { %v1299_v59 = vpop.eup %1298  ;;  %v931_v60 = vadd.f32 %v930_v58, %v929_v56  ;;  %v920_v61 = vsel %vm463_vm1, %v1297_v57, 0.0  ;;  %v1165_v58 = vld [vmem:[%s1723_s10] ss:$0 sm:$0xff] }
 0x242   : > { %v921_v62 = vsel %vm463_vm1, %v1299_v59, 0.0 }
 0x243   : > { %v932_v63 = vrot.slane %v931_v60, 4  ;;  %v922_v0 = vadd.f32 %v921_v62, %v920_v61 }
 0x245   : > { %v933_v1 = vadd.f32 %v932_v63, %v931_v60  ;;  %v923_v2 = vrot.slane %v922_v0, 4 }
 0x247   : > { %v934_v6 = vrot.slane %v933_v1, 2  ;;  %v924_v7 = vadd.f32 %v923_v2, %v922_v0 }
 0x249   : > { %v935_v8 = vadd.f32 %v934_v6, %v933_v1  ;;  %v925_v10 = vrot.slane %v924_v7, 2 }
 0x24b   : > { %v936_v11 = vrot.slane %v935_v8, 1  ;;  %v926_v12 = vadd.f32 %v925_v10, %v924_v7 }
 0x24d   : > { %v937_v13 = vadd.f32 %v936_v11, %v935_v8  ;;  %v927_v14 = vrot.slane %v926_v12, 1 }
 0x24f   : > { %1300 = vrcp.f32 %v937_v13  ;;  %v928_v15 = vadd.f32 %v927_v14, %v926_v12 }
 0x251   : > { %1302 = vrcp.f32 %v928_v15 }
 0x25c   : > { %v1301_v16 = vpop.eup %1300 }
 0x25d   : > { %v942_v17 = vmul.f32 %v1301_v16, %v1293_v54  ;;  %v943_v18 = vmul.f32 %v1301_v16, %v1295_v55 }
 0x25e   : > { %v1303_v19 = vpop.eup %1302 }
 0x25f   : > { %v946_v20 = vmul.f32 %v942_v17, %v1558_v5  ;;  %v947_v21 = vmul.f32 %v943_v18, %v1566_v9  ;;  %v939_v22 = vmul.f32 %v1303_v19, %v1297_v57  ;;  %v940_v23 = vmul.f32 %v1303_v19, %v1299_v59  ;;  %v1166_v17 = vld [vmem:[%s1724_s11] ss:$0 sm:$0xff] }
 0x261   : > { %v957_v24 = vsel %vm463_vm1, %v946_v20, 0.0  ;;  %v958_v25 = vsel %vm463_vm1, %v947_v21, 0.0  ;;  %v968_v26 = vmul.f32 %v946_v20, %v1558_v5  ;;  %v969_v27 = vmul.f32 %v947_v21, %v1566_v9  ;;  %v1167_v21 = vld [vmem:[%s1725_s12] ss:$0 sm:$0xff] }
 0x262   : > { %v959_v28 = vadd.f32 %v958_v25, %v957_v24  ;;  %v944_v29 = vmul.f32 %v939_v22, %v1554_v3  ;;  %v945_v30 = vmul.f32 %v940_v23, %v1556_v4 }
 0x263   : > { %v979_v31 = vsel %vm463_vm1, %v968_v26, 0.0  ;;  %v980_v32 = vsel %vm463_vm1, %v969_v27, 0.0 }
 0x264   : > { %v960_v33 = vrot.slane %v959_v28, 4  ;;  %v981_v34 = vadd.f32 %v980_v32, %v979_v31  ;;  %v948_v35 = vsel %vm463_vm1, %v944_v29, 0.0  ;;  %v949_v36 = vsel %vm463_vm1, %v945_v30, 0.0 }
 0x265   : > { %v950_v37 = vadd.f32 %v949_v36, %v948_v35  ;;  %v966_v5 = vmul.f32 %v944_v29, %v1554_v3  ;;  %v967_v9 = vmul.f32 %v945_v30, %v1556_v4 }
 0x266   : > { %v961_v38 = vadd.f32 %v960_v33, %v959_v28  ;;  %v982_v39 = vrot.slane %v981_v34, 4 }
 0x267   : > { %v951_v40 = vrot.slane %v950_v37, 4  ;;  %v970_v41 = vsel %vm463_vm1, %v966_v5, 0.0  ;;  %v971_v42 = vsel %vm463_vm1, %v967_v9, 0.0 }
 0x268   : > { %v962_v43 = vrot.slane %v961_v38, 2  ;;  %v983_v44 = vadd.f32 %v982_v39, %v981_v34  ;;  %v972_v45 = vadd.f32 %v971_v42, %v970_v41 }
 0x269   : > { %v952_v46 = vadd.f32 %v951_v40, %v950_v37 }
 0x26a   : > { %v963_v47 = vadd.f32 %v962_v43, %v961_v38  ;;  %v984_v48 = vrot.slane %v983_v44, 2  ;;  %v973_v49 = vrot.slane %v972_v45, 4 }
 0x26b   : > { %v953_v50 = vrot.slane %v952_v46, 2 }
 0x26c   : > { %v964_v3 = vrot.slane %v963_v47, 1  ;;  %v985_v51 = vadd.f32 %v984_v48, %v983_v44  ;;  %v974_v4 = vadd.f32 %v973_v49, %v972_v45 }
 0x26d   : > { %v954_v53 = vadd.f32 %v953_v50, %v952_v46 }
 0x26e   : > { %v965_v54 = vadd.f32 %v964_v3, %v963_v47  ;;  %v986_v55 = vrot.slane %v985_v51, 1  ;;  %v975_v56 = vrot.slane %v974_v4, 2 }
 0x26f   : > { %v955_v57 = vrot.slane %v954_v53, 1 }
 0x270   : > { %v987_v59 = vadd.f32 %v986_v55, %v985_v51  ;;  %v989_v60 = vmul.f32 %v965_v54, %v965_v54  ;;  %v1016_v61 = vmul.f32 %v1164_v52, %v965_v54  ;;  %v976_v62 = vadd.f32 %v975_v56, %v974_v4 }
 0x271   : > { %v956_v63 = vadd.f32 %v955_v57, %v954_v53 }
 0x272   : > { %v991_v0 = vsub.f32 %v987_v59, %v989_v60  ;;  %v977_v1 = vrot.slane %v976_v62, 1  ;;  %v1025_v2 = vadd.f32 %v1165_v58, %v1016_v61 }
 0x273   : > { %v988_v6 = vmul.f32 %v956_v63, %v956_v63  ;;  %v1015_v7 = vmul.f32 %v1164_v52, %v956_v63 }
 0x274   : > { %v993_v8 = vmax.f32 %v991_v0, 0.0001  ;;  %v978_v10 = vadd.f32 %v977_v1, %v976_v62  ;;  %1028 = vst.msk [vmem:[%s1646_s23 + $0x2] sm:$0x1] %vm1026_vm8, %v1025_v2 }
 0x275   : > { %v1024_v11 = vadd.f32 %v1165_v58, %v1015_v7 }
 0x276   : > { %1304 = vrsqrt.f32 %v993_v8  ;;  %v990_v12 = vsub.f32 %v978_v10, %v988_v6  ;;  %vm1003_vm9 = vcmp.eq.f32.partialorder %v993_v8, inf  ;;  %v1006_v16 = vand.u32 2147483648, %v993_v8 }
 0x277   : > { %1027 = vst.msk [vmem:[%s1646_s23] sm:$0x1] %vm1026_vm8, %v1024_v11  ;;  %vm1005_vm10 = vcmp.eq.f32.partialorder %v993_v8, 0.0 }
 0x278   : > { %v992_v13 = vmax.f32 %v990_v12, 0.0001 }
 0x27a   : > { %1306 = vrsqrt.f32 %v992_v13  ;;  %vm996_vm11 = vcmp.eq.f32.partialorder %v992_v13, inf  ;;  %v999_v24 = vand.u32 2147483648, %v992_v13  ;;  %vm998_vm12 = vcmp.eq.f32.partialorder %v992_v13, 0.0 }
 0x283   : > { %v1305_v14 = vpop.eup %1304 }
 0x284   : > { %v1002_v15 = vmul.f32 %v1305_v14, %v993_v8 }
 0x286   : > { %v1004_v18 = vsel %vm1003_vm9, %v993_v8, %v1002_v15 }
 0x287   : > { %v1307_v19 = vpop.eup %1306  ;;  %v1007_v20 = vsel %vm1005_vm10, %v1006_v16, %v1004_v18 }
 0x288   : > { %v995_v22 = vmul.f32 %v1307_v19, %v992_v13  ;;  %v1037_v23 = vmul.f32 %v1166_v17, %v1007_v20 }
 0x28a   : > { %v997_v25 = vsel %vm996_vm11, %v992_v13, %v995_v22  ;;  %v1046_v26 = vadd.f32 %v1167_v21, %v1037_v23 }
 0x28b   : > { %v1000_v27 = vsel %vm998_vm12, %v999_v24, %v997_v25 }
 0x28c   : > { %v1036_v28 = vmul.f32 %v1166_v17, %v1000_v27  ;;  %1048 = vst.msk [vmem:[%s1646_s23 + $0x3] sm:$0x1] %vm1026_vm8, %v1046_v26 }
 0x28e   : > { %v1045_v29 = vadd.f32 %v1167_v21, %v1036_v28 }
 0x290   : > { %1047 = vst.msk [vmem:[%s1646_s23 + $0x1] sm:$0x1] %vm1026_vm8, %v1045_v29 }
 0x291   : > { %1347 = shalt.err (!%p1344_p2)
}
 0x292   : > { %s1348_s30 = scalar_lea.hbm %s1665_s24, 64  ;;  %s1352_s5 = scalar_lea.hbm %s1726_s13, 128 }
 0x293   : > { %p1349_p3 = scmp.ne.s32.totalorder %s1665_s24, %s1348_s30  ;;  %p1353_p8 = scmp.lt.s32.totalorder %s1665_s24, %s1726_s13 }
 0x294   : > { %p1354_p11 = scmp.lt.s32.totalorder %s1352_s5, %s1348_s30 }
 0x295   : > { %p1350_p4 = pnand %p1349_p3, %p1515_p5 }
 0x296   : > { %p1355_p9 = por %p1354_p11, %p1353_p8 }
 0x297   : > { %p1351_p7 = pneg %p1350_p4 }
 0x299   : > { %p1356_p10 = pnand %p1355_p9, %p1351_p7 }
 0x29b   : > { %1359 = shalt.err (!%p1356_p10)
}
 0x29c   : > { %s1405_s15 = smov 32   ;;  %s1406_s22 = smov 2  }
 0x29d   : > { %1222 = dma.vmem_to_hbm [thread:$0]  (%p1515_p5), %s1667_s21, 64, %s1665_s24, %s1673_s29, %s1405_s15, %s1405_s15, %s1406_s22  }
 0x29e PF: > { %p1234_p12 = scmp.ge.s32.totalorder %s1398_s28, 2  ;;  %s1078_s16 = sand.u32 1, %s1386_s25  }
 0x29f   : > { %s1079_s0 = scalar_lea.sflag [#allocation4], %s1078_s16 }
 0x2a0   : > { %p1229_p13 = pnand %p1234_p12, %p1519_p6 }
 0x2a2   : > { %p1230_p0 = pneg %p1229_p13 }
 0x2a4   : > { %1381 = dma.done.wait (%p1230_p0), %s1079_s0, 64  }
 0x2a5   : > { %1383 = vsyncadd (%p1230_p0), %s1079_s0, 4294967232  ;;  %p24_p1 = scmp.ge.s32.totalorder %s1502_s14, 4   ;;  %s1736_s25 = smov %s1390_s26 }
 0x2a6   : > { %s1737_s26 = smov %s1394_s27  ;;  %s1738_s27 = smov %s1513_s17 }
 0x2a7   : > { %s1739_s28 = smov %s1502_s14  ;;  %26 = sbr.rel (!%p24_p1) target bundleno = 8 (0x8), region = 112 }
 0x2ac   :  { %1084 = vsyncpa [#allocation3], 1 }
 0x2ad   :  { %1086 = vsyncpa [#allocation3 + $0x1], 1 }
 0x2ae   :  { %1087 = vsyncpa [#allocation4], 1 }
 0x2af   :  { %1089 = vsyncpa [#allocation4 + $0x1], 1 }

</bundles_post_ra>
